<compile_context>
chip_gen: v5e
topology: v5e:2x2
jax: 0.10.0
libtpu: 0.0.40
codegen_flags: <defaults>
</compile_context>

<pallas_src>
import jax
import jax.numpy as jnp
from jax.experimental import pallas as pl
from jax.experimental.pallas import tpu as pltpu


def mlp_kernel(xt_ref, w1_ref, b1_ref, w2_ref, b2_ref, o_ref):
    """One batch tile of y = W2 @ tanh(W1 @ x + b1) + b2, [feature, batch] layout.

    Per grid step:
      xt_ref : (in_dim, TM)       batch on lanes (lane-dense)
      w1_ref : (hidden, in_dim)   resident weights (PyTorch [out, in] layout)
      b1_ref : (hidden, 1)
      w2_ref : (hidden, out_dim)  pre-transposed so columns slice cleanly
      b2_ref : (out_dim, 1)
      o_ref  : (out_dim, TM)      batch on lanes (lane-dense stores)

    in_dim / out_dim are tiny (1 for DemBar1D), so both "matmuls" are degenerate.
    Instead of padding them into full MXU systolic passes, they are expressed as
    VPU broadcast-multiplies plus an XLU sublane reduction (MXU stays unused).
    """
    in_dim, tm = xt_ref.shape
    hidden = w1_ref.shape[0]
    out_dim = o_ref.shape[0]

    xt = xt_ref[...]                                       # (in_dim, TM)

    # Hidden layer: tanh(W1 @ x + b1).  The tiny in_dim contraction is unrolled
    # at trace time as (hidden,1) * (1,TM) VPU broadcast-multiplies.
    z = jnp.broadcast_to(b1_ref[...], (hidden, tm))        # (hidden, TM)
    for k in range(in_dim):
        z = z + w1_ref[:, k:k + 1] * xt[k:k + 1, :]        # VPU
    h = jnp.tanh(z)                                        # EUP transcendental

    # Output layer: per output unit, VPU multiply + XLU sublane reduction over
    # the hidden dim; each (1, TM) result row is a lane-dense store.
    for o in range(out_dim):
        y = (jnp.sum(h * w2_ref[:, o:o + 1], axis=0, keepdims=True)
             + b2_ref[o:o + 1, :])
        o_ref[o:o + 1, :] = y.astype(o_ref.dtype)


def nn_forward(x, w1, b1, w2, b2, *, tm=512):
    """Pallas equivalent of NN.forward: l2(tanh(l1(x))).

    x  : (N, in_dim)
    w1 : (hidden, in_dim), b1 : (hidden,)    -- PyTorch nn.Linear layout
    w2 : (out_dim, hidden), b2 : (out_dim,)
    returns (N, out_dim)
    """
    n, in_dim = x.shape
    hidden = w1.shape[0]
    out_dim = w2.shape[0]
    assert tm % 128 == 0

    # Batch -> lane axis; pad batch up to a lane-aligned multiple of the tile.
    n_blk = -(-n // 128) * 128
    tm_eff = min(tm, n_blk)
    n_pad = -(-n_blk // tm_eff) * tm_eff
    xt = jnp.zeros((in_dim, n_pad), x.dtype).at[:, :n].set(x.T)

    b1c = b1.reshape(hidden, 1)
    w2t = w2.T                          # (hidden, out_dim)
    b2c = b2.reshape(out_dim, 1)

    out_t = pl.pallas_call(
        mlp_kernel,
        out_shape=jax.ShapeDtypeStruct((out_dim, n_pad), x.dtype),
        grid=(n_pad // tm_eff,),
        in_specs=[
            pl.BlockSpec((in_dim, tm_eff), lambda i: (0, i)),   # tile batch on lanes
            pl.BlockSpec((hidden, in_dim), lambda i: (0, 0)),   # weights resident
            pl.BlockSpec((hidden, 1), lambda i: (0, 0)),
            pl.BlockSpec((hidden, out_dim), lambda i: (0, 0)),
            pl.BlockSpec((out_dim, 1), lambda i: (0, 0)),
        ],
        out_specs=pl.BlockSpec((out_dim, tm_eff), lambda i: (0, i)),
        compiler_params=pltpu.CompilerParams(
            dimension_semantics=("parallel",)),                 # megacore-splittable
        cost_estimate=pl.CostEstimate(
            flops=2 * n_pad * hidden * (in_dim + out_dim),
            transcendentals=n_pad * hidden,
            bytes_accessed=4 * (n_pad * (in_dim + out_dim)
                                + hidden * (in_dim + out_dim + 1) + out_dim),
        ),
    )(xt, w1, b1c, w2t, b2c)
    return out_t[:, :n].T


def init_params(key, input_dim, hidden_dim, output_dim):
    """Deterministic init mimicking nn.Linear's U(-1/sqrt(fan_in), 1/sqrt(fan_in))."""
    k1, k2, k3, k4 = jax.random.split(key, 4)
    bound1 = 1.0 / (input_dim ** 0.5)
    bound2 = 1.0 / (hidden_dim ** 0.5)
    w1 = jax.random.uniform(k1, (hidden_dim, input_dim), jnp.float32, -bound1, bound1)
    b1 = jax.random.uniform(k2, (hidden_dim,), jnp.float32, -bound1, bound1)
    w2 = jax.random.uniform(k3, (output_dim, hidden_dim), jnp.float32, -bound2, bound2)
    b2 = jax.random.uniform(k4, (output_dim,), jnp.float32, -bound2, bound2)
    return w1, b1, w2, b2


if __name__ == "__main__":
    # DemBar1D uses NN(input_dim=1, hidden_dim=H, output_dim=1) over 1D bar coords.
    input_dim, hidden_dim, output_dim = 1, 32, 1

    key = jax.random.PRNGKey(0)
    kx, kp = jax.random.split(key)
    w1, b1, w2, b2 = init_params(kp, input_dim, hidden_dim, output_dim)

    # Batch all sample points along the bar into one call (amortizes the fixed
    # per-call overhead); also check a small ragged batch to exercise padding.
    for batch in (1024, 100):
        kx, sub = jax.random.split(kx)
        x = jax.random.uniform(sub, (batch, input_dim), jnp.float32)

        out = nn_forward(x, w1, b1, w2, b2)
        jax.block_until_ready(out)

        # Reference check in plain JAX (same math, PyTorch layout).
        ref = jnp.tanh(x @ w1.T + b1) @ w2.T + b2
        assert out.shape == (batch, output_dim)
        assert jnp.allclose(out, ref, atol=1e-5, rtol=1e-5)

    print("KERNEL_OK")
</pallas_src>

<mosaic_0001>
module attributes {stable_mosaic.version = 11 : i64} {
  func.func @mlp_kernel(%arg0: i32, %arg1: memref<1x512xf32, #tpu.memory_space<vmem>>, %arg2: memref<32x1xf32, #tpu.memory_space<vmem>>, %arg3: memref<32x1xf32, #tpu.memory_space<vmem>>, %arg4: memref<32x1xf32, #tpu.memory_space<vmem>>, %arg5: memref<1x1xf32, #tpu.memory_space<vmem>>, %arg6: memref<1x512xf32, #tpu.memory_space<vmem>>) attributes {dimension_semantics = [#tpu.dimension_semantics<parallel>], iteration_bounds = array<i64: 2>, scalar_prefetch = 0 : i64, scratch_operands = 0 : i64, tpu.core_type = #tpu.core_type<tc>, window_params = [{transform_indices = @transform_0, window_bounds = array<i64: 1, 512>}, {pipeline_mode = #tpu.pipeline_mode<synchronous>, transform_indices = @transform_1, window_bounds = array<i64: 32, 1>}, {pipeline_mode = #tpu.pipeline_mode<synchronous>, transform_indices = @transform_2, window_bounds = array<i64: 32, 1>}, {pipeline_mode = #tpu.pipeline_mode<synchronous>, transform_indices = @transform_3, window_bounds = array<i64: 32, 1>}, {pipeline_mode = #tpu.pipeline_mode<synchronous>, transform_indices = @transform_4, window_bounds = array<i64: 1, 1>}, {transform_indices = @transform_5, window_bounds = array<i64: 1, 512>}]} {
    %c0 = arith.constant 0 : index
    %c0_0 = arith.constant 0 : index
    %0 = vector.load %arg1[%c0, %c0_0] : memref<1x512xf32, #tpu.memory_space<vmem>>, vector<1x512xf32>
    %c0_1 = arith.constant 0 : index
    %c0_2 = arith.constant 0 : index
    %1 = vector.load %arg3[%c0_1, %c0_2] : memref<32x1xf32, #tpu.memory_space<vmem>>, vector<32x1xf32>
    %2 = vector.shape_cast %1 : vector<32x1xf32> to vector<32x1xf32>
    %3 = vector.broadcast %2 : vector<32x1xf32> to vector<32x512xf32>
    %c0_3 = arith.constant 0 : index
    %c0_4 = arith.constant 0 : index
    %4 = vector.load %arg2[%c0_3, %c0_4] : memref<32x1xf32, #tpu.memory_space<vmem>>, vector<32x1xf32>
    %5 = vector.broadcast %4 : vector<32x1xf32> to vector<32x512xf32>
    %6 = vector.broadcast %0 : vector<1x512xf32> to vector<32x512xf32>
    %7 = arith.mulf %5, %6 : vector<32x512xf32>
    %8 = arith.addf %3, %7 : vector<32x512xf32>
    %9 = math.tanh %8 : vector<32x512xf32>
    %c0_5 = arith.constant 0 : index
    %c0_6 = arith.constant 0 : index
    %10 = vector.load %arg4[%c0_5, %c0_6] : memref<32x1xf32, #tpu.memory_space<vmem>>, vector<32x1xf32>
    %11 = vector.broadcast %10 : vector<32x1xf32> to vector<32x512xf32>
    %12 = arith.mulf %9, %11 : vector<32x512xf32>
    %cst = arith.constant dense<0.000000e+00> : vector<512xf32>
    %13 = vector.multi_reduction <add>, %12, %cst [0] : vector<32x512xf32> to vector<512xf32>
    %14 = vector.shape_cast %13 : vector<512xf32> to vector<1x512xf32>
    %c0_7 = arith.constant 0 : index
    %c0_8 = arith.constant 0 : index
    %15 = vector.load %arg5[%c0_7, %c0_8] : memref<1x1xf32, #tpu.memory_space<vmem>>, vector<1x1xf32>
    %16 = vector.broadcast %15 : vector<1x1xf32> to vector<1x512xf32>
    %17 = arith.addf %14, %16 : vector<1x512xf32>
    %c0_9 = arith.constant 0 : index
    %c0_10 = arith.constant 0 : index
    %18 = vector.load %arg6[%c0_9, %c0_10] : memref<1x512xf32, #tpu.memory_space<vmem>>, vector<1x512xf32>
    tpu.vector_store %arg6[%c0_9, %c0_10], %17 {strides = array<i32>} : memref<1x512xf32, #tpu.memory_space<vmem>>, vector<1x512xf32>,
    return
  }
  func.func @transform_0(%arg0: i32) -> (i32, i32) {
    %c0_i32 = arith.constant 0 : i32
    %c0_i32_0 = arith.constant 0 : i32
    return %c0_i32, %arg0 : i32, i32
  }
  func.func @transform_1(%arg0: i32) -> (i32, i32) {
    %c0_i32 = arith.constant 0 : i32
    %c0_i32_0 = arith.constant 0 : i32
    %c0_i32_1 = arith.constant 0 : i32
    return %c0_i32, %c0_i32_0 : i32, i32
  }
  func.func @transform_2(%arg0: i32) -> (i32, i32) {
    %c0_i32 = arith.constant 0 : i32
    %c0_i32_0 = arith.constant 0 : i32
    %c0_i32_1 = arith.constant 0 : i32
    return %c0_i32, %c0_i32_0 : i32, i32
  }
  func.func @transform_3(%arg0: i32) -> (i32, i32) {
    %c0_i32 = arith.constant 0 : i32
    %c0_i32_0 = arith.constant 0 : i32
    %c0_i32_1 = arith.constant 0 : i32
    return %c0_i32, %c0_i32_0 : i32, i32
  }
  func.func @transform_4(%arg0: i32) -> (i32, i32) {
    %c0_i32 = arith.constant 0 : i32
    %c0_i32_0 = arith.constant 0 : i32
    %c0_i32_1 = arith.constant 0 : i32
    return %c0_i32, %c0_i32_0 : i32, i32
  }
  func.func @transform_5(%arg0: i32) -> (i32, i32) {
    %c0_i32 = arith.constant 0 : i32
    %c0_i32_0 = arith.constant 0 : i32
    return %c0_i32, %arg0 : i32, i32
  }
}

</mosaic_0001>

<bundles_post_ra>
// kernel: tpu_custom_call.1
= control target key start
LH: loop header
LB: loop body
LE: loop exit
PB: predicated region body
PF: predicated region fallthrough
CT: control target
= control target key end

     0   :  { %s820_s0 = inlined_call_operand.vmem [shape: f32[1,1024], index: 0, kind: input, shape index: {}]   ;;  %s821_s1 = inlined_call_operand.vmem [shape: f32[32,1], index: 1, kind: input, shape index: {}]   ;;  %s822_s2 = inlined_call_operand.vmem [shape: f32[32,1], index: 2, kind: input, shape index: {}]   ;;  %s823_s3 = inlined_call_operand.vmem [shape: f32[32,1], index: 3, kind: input, shape index: {}]   ;;  %s824_s4 = inlined_call_operand.<no memory space> [shape: f32[1,1], index: 4, kind: input, shape index: {}]   ;;  %s825_s5 = inlined_call_operand.hbm [shape: f32[1,1024], index: 5, kind: output, shape index: {}]  }
   0x1   :  { %v10_v0 = vstv %s824_s4 }
   0x2   :  { %11 = vst [vmem:[#allocation2] sm:$0x1] %v10_v0 }
   0x3   :  { %12 = vsyncpa [#allocation4], 0 }
   0x4   :  { %14 = vsyncpa [#allocation4 + $0x1], 0  ;;  %s692_s20 = smov 0   ;;  %s694_s21 = smov 0  }
   0x5   :  { %s696_s22 = smov 0   ;;  %s698_s23 = smov 0  }
   0x6 LB: > { %s508_s4 = sadd.s32 4294967295, %s656_s23   ;;  %s509_s24 = sadd.s32 4294967294, %s656_s23   ;;  %s656_s23 = sphi %s698_s23, %s831_s23   ;;  %s652_s22 = sphi %s696_s22, %s830_s22   ;;  %s648_s21 = sphi %s694_s21, %s829_s21   ;;  %s644_s20 = sphi %s692_s20, %s828_s20  }
   0x7   : > { %s715_s25 = sadd.s32 1, %s656_s23   ;;  %s137_s26 = sadd.s32 1, %s652_s22 }
   0x8   : > { %s134_s27 = ssub.s32 %s656_s23, %s715_s25  ;;  %p147_p0 = scmp.ne.s32.totalorder %s652_s22, %s648_s21 }
   0x9   : > { %p135_p1 = scmp.eq.s32.totalorder %s134_s27, 0  ;;  %p148_p2 = scmp.eq.s32.totalorder %s508_s4, 1 }
   0xa   : > { %p153_p3 = scmp.ne.s32.totalorder %s648_s21, %s644_s20  ;;  %p154_p4 = scmp.eq.s32.totalorder %s509_s24, 1 }
   0xb   : > { %s727_s28 = scalar_select %p135_p1, %s652_s22, %s137_s26  }
   0xc   : > { %p729_p5 = por %p148_p2, %p147_p0  ;;  %p733_p6 = por %p154_p4, %p153_p3 }
   0xd   : > { %p512_p7 = scmp.ge.s32.totalorder %s656_s23, 1  ;;  %p192_p8 = scmp.lt.s32.totalorder %s656_s23, 3 }
   0xf   : > { %p193_p9 = pnand %p512_p7, %p192_p8 }
  0x10   : > { %s777_s13 = sshll.u32 (!%p193_p9), %s508_s4, 2  ;;  %s216_s4 = sand.u32 (!%p193_p9), 1, %s648_s21  }
  0x11   : > { %196 = sbr.rel (%p193_p9) target bundleno = 194 (0xc2), region = 40  ;;  %p220_p10 = scmp.lt.s32.totalorder (!%p193_p9), %s777_s13, 7 }
  0x12   : > { %s513_s18 = sshll.u32 (!%p193_p9), %s216_s4, 2  ;;  %s448_s26 = scalar_lea.hbm (!%p193_p9), %s825_s5, %s777_s13 }
  0x13   : > { %s218_s27 = scalar_lea.vmem (!%p193_p9), [#allocation3], %s513_s18  ;;  %s452_s7 = sshll.u32 (!%p193_p9), %s448_s26, 4  ;;  %s453_s7 = int_to_ptr.hbm [resolvable:$true] %s452_s7 }
  0x14   : > { %s450_s6 = sshll.u32 (!%p193_p9), %s218_s27, 4  ;;  %s438_s8 = scalar_lea.sflag (!%p193_p9), [#allocation4], %s216_s4  ;;  %s451_s6 = int_to_ptr.vmem [resolvable:$true] %s450_s6 }
  0x15   : > { %s608_s9 = sshra.s32 (!%p193_p9), %s453_s7, 4  ;;  %s609_s9 = int_to_ptr.hbm [resolvable:$true] %s608_s9 }
  0x16   : > { %v250_v1 = vld [vmem:[%s821_s1] sm:$0xff]  ;;  %v658_v3 = vmov 0   ;;  %v252_v4 = vld [vmem:[%s821_s1 + $0x10] sm:$0xff]  ;;  %v251_v5 = vld [vmem:[%s821_s1 + $0x8] sm:$0xff]  ;;  %s221_s14 = scalar_select %p220_p10, %s777_s13, 7  ;;  %vm425_vm0 = vcmask 1040384  }
  0x17   : > { %v226_v2 = vld [vmem:[%s822_s2] sm:$0xff]  ;;  %560 = vset.pattern.permute.xlu1 %v658_v3  ;;  %559 = vset.pattern.permute.xlu0 %v658_v3  ;;  %v227_v6 = vld [vmem:[%s822_s2 + $0x8] sm:$0xff]  ;;  %v228_v7 = vld [vmem:[%s822_s2 + $0x10] sm:$0xff]  ;;  %vm427_vm1 = vcmask 1042434   ;;  %vm429_vm2 = vcmask 1041408   ;;  %s610_s10 = scalar_lea.hbm %s609_s9, 4  ;;  %p615_p0 = scmp.lt.s32.totalorder %s609_s9, %s825_s5 }
  0x18   : > { %256 = vperm.xlu0 %559, %v250_v1   ;;  %232 = vperm.xlu1 %560, %v226_v2   ;;  %v253_v8 = vld [vmem:[%s821_s1 + $0x18] sm:$0xff]  ;;  %v331_v10 = vld [vmem:[%s823_s3] sm:$0xff]  ;;  %v332_v11 = vld [vmem:[%s823_s3 + $0x8] sm:$0xff]  ;;  %s222_s17 = scalar_lea.vmem %s820_s0, %s221_s14  ;;  %p611_p11 = scmp.ne.s32.totalorder %s609_s9, %s610_s10 }
  0x19   : > { %561 = vset.pattern.permute.xlu2 %v658_v3  ;;  %v229_v9 = vld [vmem:[%s822_s2 + $0x18] sm:$0xff]  ;;  %v333_v12 = vld [vmem:[%s823_s3 + $0x10] sm:$0xff]  ;;  %v407_v14 = vld [vmem:[#allocation2] sm:$0x1]  ;;  %s614_s13 = scalar_lea.hbm %s825_s5, 8 }
  0x1a   : > { %266 = vperm.xlu2 %561, %v252_v4   ;;  %v334_v13 = vld [vmem:[%s823_s3 + $0x18] sm:$0xff]  ;;  %v225_v16 = vld [vmem:[%s222_s17] sm:$0xf]  ;;  %p612_p12 = pnand %p611_p11, %p729_p5  ;;  %p616_p1 = scmp.lt.s32.totalorder %s614_s13, %s610_s10 }
  0x1b   : > { %v275_v17 = vperm.slane %v225_v16, 0  ;;  %v276_v18 = vperm.slane %v225_v16, 1  ;;  %v277_v20 = vperm.slane %v225_v16, 2  ;;  %v278_v24 = vperm.slane %v225_v16, 3 }
  0x1c   : > { %p613_p13 = pneg %p612_p12  ;;  %p617_p2 = por %p616_p1, %p615_p0 }
  0x1e   : > { %p618_p3 = pnand %p617_p2, %p613_p13 }
  0x20   : > { %261 = vperm.xlu0 %559, %v251_v5   ;;  %237 = vperm.xlu1 %560, %v227_v6  }
  0x22   : > { %242 = vperm.xlu2 %561, %v228_v7  }
  0x28   : > { %271 = vperm.xlu0 %559, %v253_v8   ;;  %247 = vperm.xlu1 %560, %v229_v9  }
  0x2a   : > { %337 = vperm.xlu2 %561, %v331_v10  }
  0x30   : > { %342 = vperm.xlu0 %559, %v332_v11   ;;  %347 = vperm.xlu1 %560, %v333_v12  }
  0x32   : > { %352 = vperm.xlu2 %561, %v334_v13  }
  0x38   : > { %410 = vperm.xlu0 %559, %v407_v14  }
  0x74   : > { %v267_v15 = vpop.permute.xlu2 %266 }
  0x75   : > { %v291_v19 = vmul.f32 %v275_v17, %v267_v15  ;;  %v292_v21 = vmul.f32 %v276_v18, %v267_v15  ;;  %v293_v42 = vmul.f32 %v277_v20, %v267_v15  ;;  %v294_v45 = vmul.f32 %v278_v24, %v267_v15 }
  0x7c   : > { %v243_v25 = vpop.permute.xlu2 %242 }
  0x7d   : > { %v307_v27 = vadd.f32 %v291_v19, %v243_v25  ;;  %v308_v29 = vadd.f32 %v292_v21, %v243_v25  ;;  %v309_v50 = vadd.f32 %v293_v42, %v243_v25  ;;  %v310_v52 = vadd.f32 %v294_v45, %v243_v25 }
  0x7f   : > { %562 = vtanh.f32 %v307_v27 }
  0x80   : > { %564 = vtanh.f32 %v308_v29 }
  0x84   : > { %v338_v56 = vpop.permute.xlu2 %337 }
  0x85   : > { %v563_v47 = vpop.eup %562 }
  0x86   : > { %v565_v48 = vpop.eup %564 }
  0x8a   : > { %v257_v22 = vpop.permute.xlu0 %256  ;;  %v233_v23 = vpop.permute.xlu1 %232 }
  0x8b   : > { %v283_v26 = vmul.f32 %v275_v17, %v257_v22  ;;  %v284_v28 = vmul.f32 %v276_v18, %v257_v22  ;;  %v285_v30 = vmul.f32 %v277_v20, %v257_v22  ;;  %v286_v31 = vmul.f32 %v278_v24, %v257_v22 }
  0x8d   : > { %v299_v32 = vadd.f32 %v283_v26, %v233_v23  ;;  %v300_v33 = vadd.f32 %v284_v28, %v233_v23  ;;  %v301_v34 = vadd.f32 %v285_v30, %v233_v23  ;;  %v302_v37 = vadd.f32 %v286_v31, %v233_v23  ;;  %v353_v23 = vpop.permute.xlu2 %352 }
  0x8f   : > { %566 = vtanh.f32 %v299_v32 }
  0x90   : > { %568 = vtanh.f32 %v300_v33 }
  0x91   : > { %570 = vtanh.f32 %v301_v34 }
  0x92   : > { %v262_v35 = vpop.permute.xlu0 %261  ;;  %v238_v36 = vpop.permute.xlu1 %237  ;;  %572 = vtanh.f32 %v302_v37 }
  0x93   : > { %v287_v38 = vmul.f32 %v275_v17, %v262_v35  ;;  %v288_v39 = vmul.f32 %v276_v18, %v262_v35  ;;  %v289_v40 = vmul.f32 %v277_v20, %v262_v35  ;;  %v290_v41 = vmul.f32 %v278_v24, %v262_v35 }
  0x95   : > { %v303_v43 = vadd.f32 %v287_v38, %v238_v36  ;;  %v304_v44 = vadd.f32 %v288_v39, %v238_v36  ;;  %v305_v46 = vadd.f32 %v289_v40, %v238_v36  ;;  %v306_v49 = vadd.f32 %v290_v41, %v238_v36  ;;  %v567_v51 = vpop.eup %566 }
  0x96   : > { %v569_v55 = vpop.eup %568  ;;  %v355_v6 = vmul.f32 %v567_v51, %v338_v56 }
  0x97   : > { %574 = vtanh.f32 %v303_v43  ;;  %v571_v61 = vpop.eup %570  ;;  %v356_v10 = vmul.f32 %v569_v55, %v338_v56 }
  0x98   : > { %576 = vtanh.f32 %v304_v44  ;;  %v573_v62 = vpop.eup %572  ;;  %v357_v11 = vmul.f32 %v571_v61, %v338_v56 }
  0x99   : > { %578 = vtanh.f32 %v305_v46  ;;  %v358_v12 = vmul.f32 %v573_v62, %v338_v56 }
  0x9a   : > { %v272_v53 = vpop.permute.xlu0 %271  ;;  %v248_v54 = vpop.permute.xlu1 %247  ;;  %580 = vtanh.f32 %v306_v49 }
  0x9b   : > { %v295_v57 = vmul.f32 %v275_v17, %v272_v53  ;;  %v296_v58 = vmul.f32 %v276_v18, %v272_v53  ;;  %v297_v59 = vmul.f32 %v277_v20, %v272_v53  ;;  %v298_v60 = vmul.f32 %v278_v24, %v272_v53 }
  0x9c   : > { %582 = vtanh.f32 %v309_v50 }
  0x9d   : > { %v311_v63 = vadd.f32 %v295_v57, %v248_v54  ;;  %v312_v0 = vadd.f32 %v296_v58, %v248_v54  ;;  %v313_v1 = vadd.f32 %v297_v59, %v248_v54  ;;  %v575_v2 = vpop.eup %574  ;;  %584 = vtanh.f32 %v310_v52 }
  0x9e   : > { %v314_v3 = vadd.f32 %v298_v60, %v248_v54  ;;  %v577_v4 = vpop.eup %576 }
  0x9f   : > { %586 = vtanh.f32 %v311_v63  ;;  %v579_v5 = vpop.eup %578 }
  0xa0   : > { %588 = vtanh.f32 %v312_v0  ;;  %v581_v7 = vpop.eup %580 }
  0xa1   : > { %590 = vtanh.f32 %v313_v1 }
  0xa2   : > { %592 = vtanh.f32 %v314_v3  ;;  %v343_v8 = vpop.permute.xlu0 %342  ;;  %v348_v9 = vpop.permute.xlu1 %347 }
  0xa3   : > { %v583_v13 = vpop.eup %582  ;;  %v359_v14 = vmul.f32 %v575_v2, %v343_v8  ;;  %v360_v15 = vmul.f32 %v577_v4, %v343_v8  ;;  %v361_v16 = vmul.f32 %v579_v5, %v343_v8  ;;  %v362_v17 = vmul.f32 %v581_v7, %v343_v8 }
  0xa4   : > { %v585_v18 = vpop.eup %584  ;;  %v363_v19 = vmul.f32 %v563_v47, %v348_v9  ;;  %v364_v20 = vmul.f32 %v565_v48, %v348_v9  ;;  %v365_v21 = vmul.f32 %v583_v13, %v348_v9  ;;  %v432_v8 = vlaneseq }
  0xa5   : > { %v587_v22 = vpop.eup %586  ;;  %v371_v24 = vadd.f32 %v359_v14, %v355_v6  ;;  %v380_v25 = vadd.f32 %v360_v15, %v356_v10  ;;  %v389_v26 = vadd.f32 %v361_v16, %v357_v11  ;;  %v398_v27 = vadd.f32 %v362_v17, %v358_v12 }
  0xa6   : > { %v589_v28 = vpop.eup %588  ;;  %v366_v29 = vmul.f32 %v585_v18, %v348_v9  ;;  %v367_v30 = vmul.f32 %v587_v22, %v353_v23  ;;  %vm434_vm3 = vcmp.lt.s32.totalorder %v432_v8, 512 }
  0xa7   : > { %v591_v31 = vpop.eup %590  ;;  %v368_v32 = vmul.f32 %v589_v28, %v353_v23  ;;  %v372_v33 = vadd.f32 %v371_v24, %v363_v19  ;;  %v381_v34 = vadd.f32 %v380_v25, %v364_v20  ;;  %v390_v35 = vadd.f32 %v389_v26, %v365_v21 }
  0xa8   : > { %v593_v36 = vpop.eup %592  ;;  %v369_v37 = vmul.f32 %v591_v31, %v353_v23  ;;  %v399_v38 = vadd.f32 %v398_v27, %v366_v29 }
  0xa9   : > { %v370_v39 = vmul.f32 %v593_v36, %v353_v23  ;;  %v373_v40 = vadd.f32 %v372_v33, %v367_v30  ;;  %v382_v41 = vadd.f32 %v381_v34, %v368_v32 }
  0xaa   : > { %v391_v42 = vadd.f32 %v390_v35, %v369_v37  ;;  %v411_v59 = vpop.permute.xlu0 %410 }
  0xab   : > { %v374_v43 = vrot.slane %v373_v40, 4  ;;  %v383_v44 = vrot.slane %v382_v41, 4  ;;  %v400_v45 = vadd.f32 %v399_v38, %v370_v39  ;;  %v413_v3 = vperm.slane %v411_v59, 0 }
  0xac   : > { %v392_v46 = vrot.slane %v391_v42, 4 }
  0xad   : > { %v375_v47 = vadd.f32 %v374_v43, %v373_v40  ;;  %v384_v48 = vadd.f32 %v383_v44, %v382_v41  ;;  %v401_v49 = vrot.slane %v400_v45, 4 }
  0xae   : > { %v393_v50 = vadd.f32 %v392_v46, %v391_v42 }
  0xaf   : > { %v376_v51 = vrot.slane %v375_v47, 2  ;;  %v385_v52 = vrot.slane %v384_v48, 2  ;;  %v402_v53 = vadd.f32 %v401_v49, %v400_v45 }
  0xb0   : > { %v394_v54 = vrot.slane %v393_v50, 2 }
  0xb1   : > { %v377_v55 = vadd.f32 %v376_v51, %v375_v47  ;;  %v386_v56 = vadd.f32 %v385_v52, %v384_v48  ;;  %v403_v57 = vrot.slane %v402_v53, 2 }
  0xb2   : > { %v395_v58 = vadd.f32 %v394_v54, %v393_v50 }
  0xb3   : > { %v404_v60 = vadd.f32 %v403_v57, %v402_v53  ;;  %v378_v61 = vrot.slane %v377_v55, 1  ;;  %v387_v62 = vrot.slane %v386_v56, 1 }
  0xb4   : > { %v396_v63 = vrot.slane %v395_v58, 1 }
  0xb5   : > { %v379_v0 = vadd.f32 %v378_v61, %v377_v55  ;;  %v388_v1 = vadd.f32 %v387_v62, %v386_v56  ;;  %v405_v2 = vrot.slane %v404_v60, 1 }
  0xb6   : > { %v397_v4 = vadd.f32 %v396_v63, %v395_v58 }
  0xb7   : > { %v406_v5 = vadd.f32 %v405_v2, %v404_v60  ;;  %v415_v6 = vadd.f32 %v413_v3, %v388_v1  ;;  %v414_v9 = vadd.f32 %v413_v3, %v379_v0 }
  0xb8   : > { %v416_v7 = vadd.f32 %v413_v3, %v397_v4 }
  0xb9   : > { %v417_v10 = vadd.f32 %v413_v3, %v406_v5  ;;  %v422_v11 = vrot.slane %v415_v6, 7 }
  0xba   : > { %v423_v12 = vrot.slane %v416_v7, 6 }
  0xbb   : > { %v424_v13 = vrot.slane %v417_v10, 5  ;;  %v426_v14 = vsel %vm425_vm0, %v414_v9, %v422_v11 }
  0xbd   : > { %v428_v15 = vsel %vm427_vm1, %v423_v12, %v424_v13 }
  0xbe   : > { %v430_v16 = vsel %vm429_vm2, %v426_v14, %v428_v15 }
  0xbf   : > { %436 = vst.msk [vmem:[%s218_s27] sm:$0xf] %vm434_vm3, %v430_v16 }
  0xc0   : > { %621 = shalt.err (!%p618_p3)
}
  0xc1   : > { %519 = dma.vmem_to_hbm [thread:$0]  (%p729_p5), %s451_s6, 64, %s453_s7, %s438_s8  }
  0xc2 PF: > { %p525_p4 = scmp.ge.s32.totalorder %s656_s23, 2  ;;  %s464_s16 = sand.u32 1, %s644_s20  }
  0xc3   : > { %s465_s17 = scalar_lea.sflag [#allocation4], %s464_s16 }
  0xc4   : > { %p522_p7 = pnand %p525_p4, %p733_p6 }
  0xc6   : > { %p523_p8 = pneg %p522_p7 }
  0xc8   : > { %639 = dma.done.wait (%p523_p8), %s465_s17, 64  }
  0xc9   : > { %641 = vsyncadd (%p523_p8), %s465_s17, 4294967232  ;;  %p17_p9 = scmp.ge.s32.totalorder %s715_s25, 4   ;;  %s828_s20 = smov %s648_s21 }
  0xca   : > { %s829_s21 = smov %s652_s22  ;;  %s830_s22 = smov %s727_s28 }
  0xcb   : > { %s831_s23 = smov %s715_s25  ;;  %19 = sbr.rel (!%p17_p9) target bundleno = 6 (0x6), region = 75 }
  0xd0   :  { %471 = vsyncpa [#allocation4], 1 }
  0xd1   :  { %473 = vsyncpa [#allocation4 + $0x1], 1 }

</bundles_post_ra>
